<compile_context>
chip_gen: v7x
topology: tpu7x:2x2x1
jax: 0.10.0
libtpu: 0.0.40
codegen_flags: <defaults>
</compile_context>

<pallas_src>
import functools

import jax
import jax.numpy as jnp
from jax.experimental import pallas as pl
from jax.experimental.pallas import tpu as pltpu


def _frn_kernel(eps_ref, p_ref, x_ref, o_ref, *, tile_rows, sublane_mult, compute_dtype):
    """One grid step: a (tile_rows, HW) slab of flattened (n, c) rows.

    eps_ref : SMEM (1,) f32, already |eps|.
    p_ref   : VMEM (rows_padded, 3) f32 packed [weight, bias, tau]; resident across grid.
    x_ref   : VMEM (tile_rows, HW) activation block.
    o_ref   : VMEM (tile_rows, HW) output block.
    """
    i = pl.program_id(0)
    start = pl.multiple_of(i * tile_rows, sublane_mult)
    p = p_ref[pl.ds(start, tile_rows), :]                      # (TR, 3) f32
    w = p[:, 0:1]
    b = p[:, 1:2]
    tau = p[:, 2:3]

    x = x_ref[...]                                             # (TR, HW), native dtype
    xf = x.astype(jnp.float32)
    nu2 = jnp.mean(xf * xf, axis=-1, keepdims=True)            # (TR, 1), f32 accumulation
    inv = jax.lax.rsqrt(nu2 + eps_ref[0])                      # |eps| pre-folded on host

    # weight * (x * inv) + bias == (weight * inv) * x + bias (fold the two per-row scales).
    # Second pass optionally in bf16 on bf16-VPU chips to halve vreg / load-slot traffic.
    scale = (w * inv).astype(compute_dtype)
    y = jnp.maximum(scale * x.astype(compute_dtype) + b.astype(compute_dtype),
                    tau.astype(compute_dtype))
    o_ref[...] = y.astype(o_ref.dtype)


def _tpu_generation():
    try:
        kind = jax.devices()[0].device_kind.lower()
    except Exception:
        return 0
    if "v7" in kind or "7x" in kind:
        return 7
    for g in (6, 5, 4, 3, 2):
        if f"v{g}" in kind:
            return g
    return 0


def _tiling_policy(gen):
    # returns (target_block_bytes, vmem_cap, default_vmem_limit, min_grid_steps)
    if gen in (4, 5, 6):
        # 128 MiB physical VMEM, single TensorCore: big blocks + generous scoped limit.
        return 8 << 20, 100 << 20, 64 << 20, 1
    if gen in (2, 3):
        # Small-VMEM parts: stay tiny.
        return 1 << 20, 12 << 20, 12 << 20, 1
    # v7x (64 MiB VMEM per TC, 2 TCs) and unknown: moderate blocks, keep the grid long
    # enough (>= 4 steps) so the "parallel" axis can be sharded across both cores.
    return 4 << 20, 56 << 20, 48 << 20, 4


def frn_forward(x_nchw, weight, bias, tau, eps, *, affine=True, target_block_bytes=None):
    """x_nchw: (N, C, H, W). weight/bias/tau: (1, C, 1, 1) (weight/bias unused if
    affine=False). eps: scalar. Returns FRN(x) with the same shape/dtype as x_nchw."""
    N, C, H, W = x_nchw.shape
    HW = H * W
    rows = N * C
    itemsize = x_nchw.dtype.itemsize

    gen = _tpu_generation()
    tgt, vmem_cap, vmem_default, min_grid_steps = _tiling_policy(gen)
    if target_block_bytes is None:
        target_block_bytes = tgt

    # dtype-native sublane multiple: 8 (f32) / 16 (bf16) / 32 (int8/fp8).
    sublane_mult = max(8, 32 // max(itemsize, 1))

    # NCHW -> (N*C, HW): free reshape; HW lands on the lane axis (lane-dense stores).
    x2 = x_nchw.reshape(rows, HW)

    w1 = weight.reshape(C).astype(jnp.float32) if affine else jnp.ones((C,), jnp.float32)
    b1 = bias.reshape(C).astype(jnp.float32) if affine else jnp.zeros((C,), jnp.float32)
    t1 = tau.reshape(C).astype(jnp.float32)

    # Row tiling: keep HW whole, tile the (N*C) axis into ~target_block_bytes blocks.
    bytes_per_row = max(HW * itemsize, 1)
    tile_rows = max(1, target_block_bytes // bytes_per_row)
    if min_grid_steps > 1:
        tile_rows = min(tile_rows, max(1, rows // min_grid_steps))
    tile_rows = min(tile_rows, rows)
    if tile_rows < rows:
        tile_rows = max(sublane_mult, (tile_rows // sublane_mult) * sublane_mult)
        tile_rows = min(tile_rows, rows)
    # TODO(synk): for extreme spatial maps where even `sublane_mult` rows exceed the VMEM
    # budget (several MiB per row), add an HW grid axis ("arbitrary") with a per-row
    # sum(x^2) accumulator (two-phase); not needed for HyNet-scale feature maps.

    grid = (pl.cdiv(rows, tile_rows),)
    rows_padded = grid[0] * tile_rows

    # Pack per-(n, c) params into one (rows_padded, 3) f32 array that stays VMEM-resident
    # for the whole grid (index_map always returns block (0, 0) -> no per-step param DMA).
    params = jnp.tile(jnp.stack([w1, b1, t1], axis=-1), (N, 1))          # (N*C, 3)
    if rows_padded > rows:
        params = jnp.pad(params, ((0, rows_padded - rows), (0, 0)))

    # |eps| folded on the host.
    eps1 = jnp.abs(jnp.asarray(eps, jnp.float32)).reshape(1)

    # Scoped VMEM budget from the real footprint: double-buffered x + out blocks,
    # resident params, plus margin.
    block_bytes = tile_rows * bytes_per_row
    needed = 4 * block_bytes + rows_padded * 3 * 4 + (4 << 20)
    vmem_limit = int(min(vmem_cap, max(needed, vmem_default)))

    # Second pass in bf16 on bf16-VPU chips (v6e/v7x); reduction stays f32 everywhere.
    compute_dtype = (jnp.bfloat16
                     if (x_nchw.dtype == jnp.bfloat16 and gen >= 6)
                     else jnp.float32)

    kernel = functools.partial(_frn_kernel, tile_rows=tile_rows,
                               sublane_mult=sublane_mult, compute_dtype=compute_dtype)

    out = pl.pallas_call(
        kernel,
        out_shape=jax.ShapeDtypeStruct((rows, HW), x_nchw.dtype),
        grid_spec=pltpu.PrefetchScalarGridSpec(
            num_scalar_prefetch=0,
            grid=grid,
            in_specs=[
                pl.BlockSpec(memory_space=pltpu.SMEM),                    # |eps| scalar
                pl.BlockSpec((rows_padded, 3), lambda i: (0, 0)),         # resident params
                pl.BlockSpec((tile_rows, HW), lambda i: (i, 0)),          # x row block
            ],
            out_specs=pl.BlockSpec((tile_rows, HW), lambda i: (i, 0)),
        ),
        compiler_params=pltpu.CompilerParams(
            dimension_semantics=("parallel",),
            vmem_limit_bytes=vmem_limit,
        ),
    )(eps1, params, x2)

    # (N*C, HW) -> NCHW: free reshape again.
    return out.reshape(N, C, H, W)


def frn_reference(x, weight, bias, tau, eps, affine=True):
    xf = x.astype(jnp.float32)
    nu2 = jnp.mean(xf * xf, axis=(2, 3), keepdims=True)
    y = xf * jax.lax.rsqrt(nu2 + jnp.abs(eps))
    if affine:
        y = weight * y + bias
    return jnp.maximum(y, tau).astype(x.dtype)


if __name__ == "__main__":
    # Deterministic parameter init mirroring FRN.__init__ / initialize_weights:
    #   weight = ones(1,C,1,1), bias = zeros(1,C,1,1), tau = init_tau (=-1), eps = 1e-6
    init_tau = -1.0
    eps = jnp.float32(1e-6)
    key = jax.random.PRNGKey(0)
    k1, k2 = jax.random.split(key)

    # Main check: module-scale shapes.
    N, C, H, W = 2, 4, 16, 16
    x = jax.random.normal(k1, (N, C, H, W), dtype=jnp.float32)
    weight = jnp.ones((1, C, 1, 1), jnp.float32)
    bias = jnp.zeros((1, C, 1, 1), jnp.float32)
    tau = jnp.full((1, C, 1, 1), init_tau, jnp.float32)

    out = jax.block_until_ready(frn_forward(x, weight, bias, tau, eps, affine=True))
    ref = frn_reference(x, weight, bias, tau, eps, affine=True)
    assert out.shape == (N, C, H, W)
    assert jnp.allclose(out, ref, atol=1e-5, rtol=1e-5), "Pallas FRN mismatch (main shape)"

    # Second check with a tiny block budget to exercise the multi-step grid, the partial
    # last row block, and the resident-params row slicing.
    N2, C2, H2, W2 = 3, 5, 16, 8
    x2 = jax.random.normal(k2, (N2, C2, H2, W2), dtype=jnp.float32) * 2.0 + 0.5
    w2 = jnp.linspace(0.5, 1.5, C2).reshape(1, C2, 1, 1).astype(jnp.float32)
    b2 = jnp.linspace(-0.2, 0.3, C2).reshape(1, C2, 1, 1).astype(jnp.float32)
    t2 = jnp.linspace(-1.0, 0.1, C2).reshape(1, C2, 1, 1).astype(jnp.float32)

    out2 = jax.block_until_ready(
        frn_forward(x2, w2, b2, t2, eps, affine=True, target_block_bytes=2048))
    ref2 = frn_reference(x2, w2, b2, t2, eps, affine=True)
    assert jnp.allclose(out2, ref2, atol=1e-5, rtol=1e-5), "Pallas FRN mismatch (tiled shape)"

    print("KERNEL_OK")
</pallas_src>

<mosaic_0001>
module attributes {stable_mosaic.version = 11 : i64} {
  func.func @_frn_kernel(%arg0: i32, %arg1: memref<1xf32, #tpu.memory_space<smem>>, %arg2: memref<8x3xf32, #tpu.memory_space<vmem>>, %arg3: memref<8x256xf32, #tpu.memory_space<vmem>>, %arg4: memref<8x256xf32, #tpu.memory_space<vmem>>) attributes {dimension_semantics = [#tpu.dimension_semantics<parallel>], iteration_bounds = array<i64: 1>, scalar_prefetch = 0 : i64, scratch_operands = 0 : i64, tpu.core_type = #tpu.core_type<tc>, window_params = [{transform_indices = @transform_0, window_bounds = array<i64: 1>}, {pipeline_mode = #tpu.pipeline_mode<synchronous>, transform_indices = @transform_1, window_bounds = array<i64: 8, 3>}, {transform_indices = @transform_2, window_bounds = array<i64: 8, 256>}, {transform_indices = @transform_3, window_bounds = array<i64: 8, 256>}]} {
    %c8_i32 = arith.constant 8 : i32
    %0 = arith.muli %arg0, %c8_i32 : i32
    %1 = tpu.assume_multiple %0, 8 : i32
    %2 = arith.index_cast %1 : i32 to index
    %c0 = arith.constant 0 : index
    %3 = vector.load %arg2[%2, %c0] : memref<8x3xf32, #tpu.memory_space<vmem>>, vector<8x3xf32>
    %4 = vector.extract_strided_slice %3 {offsets = [0, 0], sizes = [8, 1], strides = [1, 1]} : vector<8x3xf32> to vector<8x1xf32>
    %5 = vector.extract_strided_slice %3 {offsets = [0, 1], sizes = [8, 1], strides = [1, 1]} : vector<8x3xf32> to vector<8x1xf32>
    %6 = vector.extract_strided_slice %3 {offsets = [0, 2], sizes = [8, 1], strides = [1, 1]} : vector<8x3xf32> to vector<8x1xf32>
    %c0_0 = arith.constant 0 : index
    %c0_1 = arith.constant 0 : index
    %7 = vector.load %arg3[%c0_0, %c0_1] : memref<8x256xf32, #tpu.memory_space<vmem>>, vector<8x256xf32>
    %8 = arith.mulf %7, %7 : vector<8x256xf32>
    %cst = arith.constant dense<0.000000e+00> : vector<8xf32>
    %9 = vector.multi_reduction <add>, %8, %cst [1] : vector<8x256xf32> to vector<8xf32>
    %10 = vector.shape_cast %9 : vector<8xf32> to vector<8x1xf32>
    %cst_2 = arith.constant 2.560000e+02 : f32
    %11 = vector.broadcast %cst_2 : f32 to vector<8x1xf32>
    %12 = arith.divf %10, %11 : vector<8x1xf32>
    %c0_3 = arith.constant 0 : index
    %13 = memref.load %arg1[%c0_3] : memref<1xf32, #tpu.memory_space<smem>>
    %14 = vector.broadcast %13 : f32 to vector<8x1xf32>
    %15 = arith.addf %12, %14 : vector<8x1xf32>
    %16 = math.rsqrt %15 : vector<8x1xf32>
    %17 = arith.mulf %4, %16 : vector<8x1xf32>
    %18 = vector.broadcast %17 : vector<8x1xf32> to vector<8x256xf32>
    %19 = arith.mulf %18, %7 : vector<8x256xf32>
    %20 = vector.broadcast %5 : vector<8x1xf32> to vector<8x256xf32>
    %21 = arith.addf %19, %20 : vector<8x256xf32>
    %22 = vector.broadcast %6 : vector<8x1xf32> to vector<8x256xf32>
    %23 = arith.maximumf %21, %22 : vector<8x256xf32>
    %c0_4 = arith.constant 0 : index
    %c0_5 = arith.constant 0 : index
    %24 = vector.load %arg4[%c0_4, %c0_5] : memref<8x256xf32, #tpu.memory_space<vmem>>, vector<8x256xf32>
    tpu.vector_store %arg4[%c0_4, %c0_5], %23 {strides = array<i32>} : memref<8x256xf32, #tpu.memory_space<vmem>>, vector<8x256xf32>,
    return
  }
  func.func @transform_0(%arg0: i32) -> i32 {
    %c0_i32 = arith.constant 0 : i32
    %c0_i32_0 = arith.constant 0 : i32
    return %c0_i32 : i32
  }
  func.func @transform_1(%arg0: i32) -> (i32, i32) {
    %c0_i32 = arith.constant 0 : i32
    %c0_i32_0 = arith.constant 0 : i32
    %c0_i32_1 = arith.constant 0 : i32
    return %c0_i32, %c0_i32_0 : i32, i32
  }
  func.func @transform_2(%arg0: i32) -> (i32, i32) {
    %c0_i32 = arith.constant 0 : i32
    %c0_i32_0 = arith.constant 0 : i32
    return %arg0, %c0_i32 : i32, i32
  }
  func.func @transform_3(%arg0: i32) -> (i32, i32) {
    %c0_i32 = arith.constant 0 : i32
    %c0_i32_0 = arith.constant 0 : i32
    return %arg0, %c0_i32 : i32, i32
  }
}

</mosaic_0001>

<bundles_post_ra>
// kernel: tpu_custom_call.1
= control target key start
LH: loop header
LB: loop body
LE: loop exit
PB: predicated region body
PF: predicated region fallthrough
CT: control target
= control target key end

     0   :  { %s151_s0 = inlined_call_operand.<no memory space> [shape: f32[1], index: 0, kind: input, shape index: {}]   ;;  %s152_s1 = inlined_call_operand.vmem [shape: f32[8,3], index: 1, kind: input, shape index: {}]   ;;  %s153_s2 = inlined_call_operand.vmem [shape: f32[8,256], index: 2, kind: input, shape index: {}]   ;;  %s154_s3 = inlined_call_operand.hbm [shape: f32[8,256], index: 3, kind: output, shape index: {}]  }
   0x1   :  { %v19_v0 = vld [vmem:[%s153_s2] sm:$0xff]  ;;  %v20_v1 = vld [vmem:[%s153_s2 + $0x8] sm:$0xff] }
   0x2   :  { %9 = vsyncpa [#allocation4], 0  ;;  %v21_v2 = vmul.f32 %v19_v0, %v19_v0  ;;  %v22_v3 = vmul.f32 %v20_v1, %v20_v1  ;;  %v18_v5 = vld [vmem:[%s152_s1] sm:$0xff]  ;;  %v103_v6 = vmov 1   ;;  %v104_v7 = vmov 0   ;;  %s106_s1 = smov [#allocation3]  }
   0x3   :  { %74 = vset.pattern.permute.xlu1 %v103_v6  ;;  %73 = vset.pattern.permute.xlu0 %v104_v7  ;;  %v105_v8 = vmov 2   ;;  %v29_v9 = vstv %s151_s0  ;;  %s61_s2 = sshll.u32 %s106_s1, 4  ;;  %s62_s2 = int_to_ptr.vmem [resolvable:$true] %s61_s2 }
   0x4   :  { %v23_v4 = vadd.f32 %v22_v3, %v21_v2  ;;  %42 = vperm.xlu1 %74, %v18_v5   ;;  %s79_s0 = scalar_lea.vmem %s62_s2, 256  ;;  %p84_p1 = scmp.lt.s32.totalorder %s62_s2, %s62_s2 }
   0x5   :  { %p80_p0 = scmp.ne.s32.totalorder %s62_s2, %s79_s0  ;;  %p85_p2 = scmp.lt.s32.totalorder %s79_s0, %s79_s0 }
   0x6   :  { %24 = vadd.xlane.f32.xlu0 %v23_v4 }
   0x7   :  { %p86_p3 = por %p85_p2, %p84_p1 }
   0x8   :  { %75 = vset.pattern.permute.xlu1 %v105_v8 }
   0x9   :  { %48 = vperm.xlu1 %75, %v18_v5   ;;  %p87_p4 = pnand %p86_p3, %p80_p0 }
  0x83   :  { %v43_v15 = vpop.permute.xlu1 %42 }
  0x88   :  { %v49_v19 = vpop.permute.xlu1 %48 }
  0x93   :  { %v25_v10 = vpop.xlane.xlu0 %24 }
  0x94   :  { %v27_v11 = vmul.f32 0.00390625, %v25_v10 }
  0x96   :  { %v30_v12 = vadd.f32 %v29_v9, %v27_v11 }
  0x98   :  { %77 = vrsqrt.f32 %v30_v12 }
  0xa2   :  { %v78_v13 = vpop.eup %77 }
  0xa3   :  { %v32_v14 = vmul.f32 %v78_v13, %v18_v5 }
  0xa5   :  { %35 = vperm.xlu0 %73, %v32_v14  }
  0xa9   :  { %76 = vset.pattern.permute.xlu0 %v105_v8 }
 0x124   :  { %v36_v16 = vpop.permute.xlu0 %35 }
 0x125   :  { %v38_v17 = vmul.f32 %v36_v16, %v19_v0  ;;  %v39_v18 = vmul.f32 %v36_v16, %v20_v1 }
 0x127   :  { %v45_v20 = vadd.f32 %v43_v15, %v38_v17  ;;  %v46_v21 = vadd.f32 %v43_v15, %v39_v18 }
 0x129   :  { %v51_v22 = vmax.f32 %v45_v20, %v49_v19  ;;  %v52_v23 = vmax.f32 %v46_v21, %v49_v19 }
 0x12b   :  { %53 = vst [vmem:[#allocation3] sm:$0xff] %v51_v22  ;;  %54 = vst [vmem:[#allocation3 + $0x8] sm:$0xff] %v52_v23 }
 0x12c   :  { %90 = shalt.err (!%p87_p4)
}
 0x12d   :  { %s91_s22 = scalar_lea.hbm %s154_s3, 256 }
 0x12e   :  { %p92_p5 = scmp.ne.s32.totalorder %s154_s3, %s91_s22  ;;  %p95_p6 = scmp.lt.u32.totalorder %s91_s22, %s154_s3 }
 0x130   :  { %p97_p7 = pnand %p95_p6, %p92_p5 }
 0x132   :  { %100 = shalt.err (!%p97_p7)
}
 0x133   :  { %64 = dma.vmem_to_hbm [thread:$0]  %s62_s2, 256, %s154_s3, [#allocation4]  }
 0x134   :  { %101 = dma.done.wait [#allocation4], 256  }
 0x135   :  { %102 = vsyncadd [#allocation4], 4294967040 }
 0x136   :  { %68 = vsyncpa [#allocation4], 1 }

</bundles_post_ra>
